<compile_context>
chip_gen: v7x
topology: tpu7x:2x2x1
jax: 0.10.0
libtpu: 0.0.40
codegen_flags: <defaults>
</compile_context>

<pallas_src>
import math

import jax
import jax.numpy as jnp
from jax.experimental import pallas as pl
from jax.experimental.pallas import tpu as pltpu


_LANES = 128
_SUBLANES = 8
# Target x/out tile: 2048 rows * 128 lanes * 4 B = 1 MiB f32 per buffer.
# Double-buffered x + out + PE ~= 5-6 MiB -> fits the 16 MiB v5e scoped-VMEM
# default and leaves plenty of headroom under v7x's 64 MiB physical VMEM.
_MAX_TILE_ROWS = 2048


# ----------------------------------------------------------------------------
# Kernel: elementwise add of the shared positional-encoding tile.
# x_ref / o_ref: (TB, TR, 128); pe_ref: (TR, 128) broadcast over the batch tile.
# ----------------------------------------------------------------------------
def _pe_add_kernel(x_ref, pe_ref, o_ref):
    o_ref[...] = x_ref[...] + pe_ref[...][None]
    # TODO(synk): train-mode dropout not implemented (eval mode: identity).


def _padded_len(flat_len):
    """Flattened length padded so rows = len/128 is a multiple of 8 (lane-dense)."""
    quantum = _SUBLANES * _LANES
    return ((flat_len + quantum - 1) // quantum) * quantum


# ----------------------------------------------------------------------------
# PE table construction (mirrors the PyTorch __init__)
# ----------------------------------------------------------------------------
def make_pe(sequence_len, dim, dtype=jnp.float32):
    assert dim % 2 == 0, "PositionalEncoding requires an even embedding dim"
    position = jnp.arange(sequence_len, dtype=jnp.float32)[:, None]
    div_term = jnp.exp(
        jnp.arange(0, dim, 2, dtype=jnp.float32) * (-math.log(10000.0) / dim))
    pe = jnp.zeros((sequence_len, dim), jnp.float32)
    pe = pe.at[:, 0::2].set(jnp.sin(position * div_term))
    pe = pe.at[:, 1::2].set(jnp.cos(position * div_term))
    return pe.astype(dtype)


def prepare_pe_slab(pe):
    """One-time (init / register_buffer-style) prep: PE as a lane-dense (rows, 128) slab."""
    seq_len, dim = pe.shape
    n = seq_len * dim
    n_pad = _padded_len(n)
    flat = pe.reshape(n)
    if n_pad != n:
        flat = jnp.pad(flat, (0, n_pad - n))
    return flat.reshape(n_pad // _LANES, _LANES)


# ----------------------------------------------------------------------------
# Wrapper (forward)
# ----------------------------------------------------------------------------
def positional_encoding(x, pe_slab):
    """x: (B, S, D); pe_slab: (pe_rows, 128) from prepare_pe_slab (same dtype as x).

    Returns x + pe[:S] (dropout is identity at inference).
    """
    B, S, D = x.shape
    n = S * D
    n_pad = _padded_len(n)
    rows = n_pad // _LANES
    assert pe_slab.shape[0] >= rows and pe_slab.shape[1] == _LANES, (
        "PE table too short for this sequence length")

    # Lane-dense presentation (B, rows, 128), rows a multiple of 8 -> no masked stores.
    x_flat = x.reshape(B, n)
    if n_pad != n:
        x_flat = jnp.pad(x_flat, ((0, 0), (0, n_pad - n)))
    x_in = x_flat.reshape(B, rows, _LANES)

    # Tile choice: cap the row chunk at ~1 MiB f32; for tiny per-batch slabs pack
    # several batch elements per grid step to amortize per-step overhead.
    if rows >= _MAX_TILE_ROWS:
        tr, tb = _MAX_TILE_ROWS, 1
    else:
        tr = rows                                   # rows is a multiple of 8
        tb = min(B, max(1, _MAX_TILE_ROWS // rows))
    grid = (pl.cdiv(B, tb), pl.cdiv(rows, tr))

    # PE block index is constant across the grid when there is a single row chunk:
    # single-buffer it to save VMEM; otherwise keep default double-buffering.
    if grid[1] == 1:
        pe_spec = pl.BlockSpec((tr, _LANES), lambda b, r: (r, 0),
                               pipeline_mode=pl.Buffered(1))
    else:
        pe_spec = pl.BlockSpec((tr, _LANES), lambda b, r: (r, 0))

    out = pl.pallas_call(
        _pe_add_kernel,
        out_shape=jax.ShapeDtypeStruct((B, rows, _LANES), x.dtype),
        grid=grid,
        in_specs=[
            pl.BlockSpec((tb, tr, _LANES), lambda b, r: (b, r, 0)),  # activations
            pe_spec,                                                 # shared PE tile
        ],
        out_specs=pl.BlockSpec((tb, tr, _LANES), lambda b, r: (b, r, 0)),
        compiler_params=pltpu.CompilerParams(
            # Purely elementwise: both axes independent -> shard across the two
            # TensorCores on v7x even when B == 1; neutral on v5e / v6e.
            dimension_semantics=("parallel", "parallel")),
    )(x_in, pe_slab)

    out_flat = out.reshape(B, n_pad)
    if n_pad != n:
        out_flat = out_flat[:, :n]
    return out_flat.reshape(B, S, D)


# ----------------------------------------------------------------------------
if __name__ == "__main__":
    B, S, D, MAXLEN = 2, 8, 32, 16                  # dim=32, sequence_len=16, seq used=8
    key = jax.random.PRNGKey(0)
    x = jax.random.normal(key, (B, S, D), jnp.float32)

    pe = make_pe(MAXLEN, D)                         # "__init__": build the table ...
    pe_slab = prepare_pe_slab(pe)                   # ... and its lane-dense slab once

    out = jax.block_until_ready(positional_encoding(x, pe_slab))

    ref = x + pe[None, :S]                          # dropout is identity at inference
    assert out.shape == (B, S, D)
    assert jnp.allclose(out, ref, rtol=1e-6, atol=1e-6), (out, ref)
    print("KERNEL_OK")
</pallas_src>

<mosaic_0001>
module attributes {stable_mosaic.version = 11 : i64} {
  func.func @_pe_add_kernel(%arg0: i32, %arg1: i32, %arg2: memref<2x8x128xf32, #tpu.memory_space<vmem>>, %arg3: memref<8x128xf32, #tpu.memory_space<vmem>>, %arg4: memref<2x8x128xf32, #tpu.memory_space<vmem>>) attributes {dimension_semantics = [#tpu.dimension_semantics<parallel>, #tpu.dimension_semantics<parallel>], iteration_bounds = array<i64: 1, 1>, scalar_prefetch = 0 : i64, scratch_operands = 0 : i64, tpu.core_type = #tpu.core_type<tc>, window_params = [{transform_indices = @transform_0, window_bounds = array<i64: 2, 8, 128>}, {pipeline_mode = #tpu.pipeline_mode<synchronous>, transform_indices = @transform_1, window_bounds = array<i64: 8, 128>}, {transform_indices = @transform_2, window_bounds = array<i64: 2, 8, 128>}]} {
    %c0 = arith.constant 0 : index
    %c0_0 = arith.constant 0 : index
    %c0_1 = arith.constant 0 : index
    %0 = vector.load %arg2[%c0, %c0_0, %c0_1] : memref<2x8x128xf32, #tpu.memory_space<vmem>>, vector<2x8x128xf32>
    %c0_2 = arith.constant 0 : index
    %c0_3 = arith.constant 0 : index
    %1 = vector.load %arg3[%c0_2, %c0_3] : memref<8x128xf32, #tpu.memory_space<vmem>>, vector<8x128xf32>
    %2 = vector.shape_cast %1 : vector<8x128xf32> to vector<1x8x128xf32>
    %3 = vector.broadcast %2 : vector<1x8x128xf32> to vector<2x8x128xf32>
    %4 = arith.addf %0, %3 : vector<2x8x128xf32>
    %c0_4 = arith.constant 0 : index
    %c0_5 = arith.constant 0 : index
    %c0_6 = arith.constant 0 : index
    %5 = vector.load %arg4[%c0_4, %c0_5, %c0_6] : memref<2x8x128xf32, #tpu.memory_space<vmem>>, vector<2x8x128xf32>
    tpu.vector_store %arg4[%c0_4, %c0_5, %c0_6], %4 {strides = array<i32>} : memref<2x8x128xf32, #tpu.memory_space<vmem>>, vector<2x8x128xf32>,
    return
  }
  func.func @transform_0(%arg0: i32, %arg1: i32) -> (i32, i32, i32) {
    %c0_i32 = arith.constant 0 : i32
    %c0_i32_0 = arith.constant 0 : i32
    return %arg0, %arg1, %c0_i32 : i32, i32, i32
  }
  func.func @transform_1(%arg0: i32, %arg1: i32) -> (i32, i32) {
    %c0_i32 = arith.constant 0 : i32
    %c0_i32_0 = arith.constant 0 : i32
    return %arg1, %c0_i32 : i32, i32
  }
  func.func @transform_2(%arg0: i32, %arg1: i32) -> (i32, i32, i32) {
    %c0_i32 = arith.constant 0 : i32
    %c0_i32_0 = arith.constant 0 : i32
    return %arg0, %arg1, %c0_i32 : i32, i32, i32
  }
}

</mosaic_0001>

<bundles_post_ra>
// kernel: tpu_custom_call.1
= control target key start
LH: loop header
LB: loop body
LE: loop exit
PB: predicated region body
PF: predicated region fallthrough
CT: control target
= control target key end

     0   :  { %7 = vsyncpa [#allocation3], 0  ;;  %s202_s0 = inlined_call_operand.hbm [shape: f32[2,8,128], index: 0, kind: input, shape index: {}]   ;;  %s203_s1 = inlined_call_operand.hbm [shape: f32[8,128], index: 1, kind: input, shape index: {}]   ;;  %s204_s2 = inlined_call_operand.hbm [shape: f32[2,8,128], index: 2, kind: output, shape index: {}]  }
   0x1   :  { %8 = vsyncpa [#allocation6], 0 }
   0x2   :  { %9 = vsyncpa [#allocation4], 0  ;;  %s140_s9 = smov [#allocation2]   ;;  %s68_s13 = scalar_lea.hbm %s202_s0, 256 }
   0x3   :  { %s15_s10 = sshll.u32 %s140_s9, 4  ;;  %p69_p0 = scmp.ne.s32.totalorder %s202_s0, %s68_s13  ;;  %s16_s10 = int_to_ptr.vmem [resolvable:$true] %s15_s10 }
   0x4   :  { %p72_p1 = scmp.lt.u32.totalorder %s68_s13, %s202_s0 }
   0x6   :  { %p74_p2 = pnand %p72_p1, %p69_p0 }
   0x8   :  { %77 = shalt.err (!%p74_p2)
}
   0x9   :  { %s78_s18 = scalar_lea.vmem %s16_s10, 256  ;;  %p83_p4 = scmp.lt.s32.totalorder %s16_s10, %s16_s10 }
   0xa   :  { %p79_p3 = scmp.ne.s32.totalorder %s16_s10, %s78_s18  ;;  %p84_p5 = scmp.lt.s32.totalorder %s78_s18, %s78_s18 }
   0xc   :  { %p85_p6 = por %p84_p5, %p83_p4 }
   0xe   :  { %p86_p7 = pnand %p85_p6, %p79_p3 }
  0x10   :  { %89 = shalt.err (!%p86_p7)
}
  0x11   :  { %s141_s19 = smov 128   ;;  %s142_s20 = smov 8  }
  0x12   :  { %21 = dma.hbm_to_vmem [thread:$0]  %s202_s0, 256, %s16_s10, [#allocation3], %s141_s19, %s141_s19, %s142_s20  }
  0x13   :  { %s143_s23 = smov [#allocation5]   ;;  %s90_s27 = scalar_lea.hbm %s203_s1, 128 }
  0x14   :  { %s28_s24 = sshll.u32 %s143_s23, 4  ;;  %p91_p8 = scmp.ne.s32.totalorder %s203_s1, %s90_s27  ;;  %s29_s24 = int_to_ptr.vmem [resolvable:$true] %s28_s24 }
  0x15   :  { %p94_p9 = scmp.lt.u32.totalorder %s90_s27, %s203_s1 }
  0x17   :  { %p96_p10 = pnand %p94_p9, %p91_p8 }
  0x19   :  { %99 = shalt.err (!%p96_p10)
}
  0x1a   :  { %s100_s4 = scalar_lea.vmem %s29_s24, 128  ;;  %p105_p12 = scmp.lt.s32.totalorder %s29_s24, %s29_s24 }
  0x1b   :  { %p101_p11 = scmp.ne.s32.totalorder %s29_s24, %s100_s4  ;;  %p106_p13 = scmp.lt.s32.totalorder %s100_s4, %s100_s4 }
  0x1d   :  { %p107_p0 = por %p106_p13, %p105_p12 }
  0x1f   :  { %p108_p1 = pnand %p107_p0, %p101_p11 }
  0x21   :  { %111 = shalt.err (!%p108_p1)
}
  0x22   :  { %31 = dma.hbm_to_vmem [thread:$0]  %s203_s1, 128, %s29_s24, [#allocation6]  }
  0x23   :  { %134 = dma.done.wait [#allocation3], 256  }
  0x24   :  { %135 = vsyncadd [#allocation3], 4294967040 }
  0x25   :  { %136 = dma.done.wait [#allocation6], 128  }
  0x26   :  { %137 = vsyncadd [#allocation6], 4294967168  ;;  %s144_s6 = smov [#allocation7]   ;;  %v38_v0 = vld [vmem:[#allocation2] sm:$0xff]  ;;  %v40_v1 = vld [vmem:[#allocation5] sm:$0xff] }
  0x27   :  { %s50_s7 = sshll.u32 %s144_s6, 4  ;;  %v39_v2 = vld [vmem:[#allocation2 + $0x8] sm:$0xff]  ;;  %v41_v3 = vadd.f32 %v40_v1, %v38_v0  ;;  %s51_s7 = int_to_ptr.vmem [resolvable:$true] %s50_s7 }
  0x28   :  { %v42_v4 = vadd.f32 %v40_v1, %v39_v2  ;;  %s112_s8 = scalar_lea.vmem %s51_s7, 256  ;;  %p117_p3 = scmp.lt.s32.totalorder %s51_s7, %s51_s7 }
  0x29   :  { %43 = vst [vmem:[#allocation7] sm:$0xff] %v41_v3  ;;  %p113_p2 = scmp.ne.s32.totalorder %s51_s7, %s112_s8  ;;  %p118_p4 = scmp.lt.s32.totalorder %s112_s8, %s112_s8 }
  0x2a   :  { %44 = vst [vmem:[#allocation7 + $0x8] sm:$0xff] %v42_v4 }
  0x2b   :  { %p119_p5 = por %p118_p4, %p117_p3 }
  0x2d   :  { %p120_p6 = pnand %p119_p5, %p113_p2 }
  0x2f   :  { %123 = shalt.err (!%p120_p6)
}
  0x30   :  { %s124_s10 = scalar_lea.hbm %s204_s2, 256 }
  0x31   :  { %p125_p7 = scmp.ne.s32.totalorder %s204_s2, %s124_s10  ;;  %p128_p8 = scmp.lt.u32.totalorder %s124_s10, %s204_s2 }
  0x33   :  { %p130_p9 = pnand %p128_p8, %p125_p7 }
  0x35   :  { %133 = shalt.err (!%p130_p9)
}
  0x36   :  { %56 = dma.vmem_to_hbm [thread:$0]  %s51_s7, 256, %s204_s2, [#allocation4], %s141_s19, %s141_s19, %s142_s20  }
  0x37   :  { %138 = dma.done.wait [#allocation4], 256  }
  0x38   :  { %139 = vsyncadd [#allocation4], 4294967040 }
  0x39   :  { %60 = vsyncpa [#allocation3], 1 }
  0x3a   :  { %61 = vsyncpa [#allocation6], 1 }
  0x3b   :  { %62 = vsyncpa [#allocation4], 1 }

</bundles_post_ra>
